<compile_context>
chip_gen: v6e
topology: v6e:2x2x1
jax: 0.10.0
libtpu: 0.0.40
codegen_flags: <defaults>
</compile_context>

<pallas_src>
import jax
import jax.numpy as jnp
from jax.experimental import pallas as pl
from jax.experimental.pallas import tpu as pltpu


def _eval_model_kernel(
    x_ref,      # (F, TB)  f32  input tile, batch on lanes
    cw0_ref,    # (F, 1)   f32  CrossNet kernel 0
    cb0_ref,    # (F, 1)   f32  CrossNet bias   0
    cw1_ref,    # (F, 1)   f32  CrossNet kernel 1
    cb1_ref,    # (F, 1)   f32  CrossNet bias   1
    w1x_ref,    # (F, F)   bf16 ChannelAttention fc[0].weight[:, :F]  (x half)
    w1c_ref,    # (F, F)   bf16 ChannelAttention fc[0].weight[:, F:]  (cross half)
    w2_ref,     # (2F, F)  bf16 ChannelAttention fc[2].weight (whole)
    wax_ref,    # (2F, F)  bf16 head Linear0 weight[:, :F]
    wac_ref,    # (2F, F)  bf16 head Linear0 weight[:, F:]
    ba_ref,     # (2F, 1)  f32  head Linear0 bias
    wb_ref,     # (2F, 1)  f32  head Linear1 weight (stored as a column)
    bb_ref,     # (1, 1)   f32  head Linear1 bias (SMEM scalar)
    o_ref,      # (1, TB)  f32  output tile (lane-dense)
):
    x = x_ref[...]                                                 # (F, TB) f32
    F = x.shape[0]

    # ---- CrossNet (layer_num = 2), feature-major ------------------------
    # x_l <- x_0 * <x_l, w_i> + b_i + x_l.  The per-sample scalar <x_l, w_i>
    # is a VPU multiply + sublane reduce (keeps the N=1 matmul off the MXU).
    x0 = x
    xl = x
    for cw_ref, cbias_ref in ((cw0_ref, cb0_ref), (cw1_ref, cb1_ref)):
        xl_w = jnp.sum(xl * cw_ref[...], axis=0, keepdims=True)    # (1, TB)
        xl = x0 * xl_w + cbias_ref[...] + xl                       # (F, TB)
    cross = xl

    # ---- CBAM / ChannelAttention -----------------------------------------
    # AdaptiveAvgPool1d(1) over a singleton trailing dim is the identity.
    # stack = concat([x, cross]) is never materialized: fc[0] weight is
    # pre-split, so W1 @ stack == W1x @ x + W1c @ cross.  The F->2F
    # projection runs whole; gates for x / cross are an aligned sublane slice.
    xb = x.astype(jnp.bfloat16)
    crb = cross.astype(jnp.bfloat16)
    hid = (jnp.dot(w1x_ref[...], xb, preferred_element_type=jnp.float32) +
           jnp.dot(w1c_ref[...], crb, preferred_element_type=jnp.float32))  # (F, TB)
    hid = jnp.maximum(hid, 0.0).astype(jnp.bfloat16)                        # ReLU
    gate = jax.nn.sigmoid(
        jnp.dot(w2_ref[...], hid, preferred_element_type=jnp.float32))      # (2F, TB)
    att_x = (x * gate[:F]).astype(jnp.bfloat16)                             # (F, TB)
    att_c = (cross * gate[F:]).astype(jnp.bfloat16)                         # (F, TB)

    # ---- head: Linear(2F->2F)+b -> LeakyReLU(0.01) -> Linear(2F->1)+b -> Sigmoid
    h = (jnp.dot(wax_ref[...], att_x, preferred_element_type=jnp.float32) +
         jnp.dot(wac_ref[...], att_c, preferred_element_type=jnp.float32) +
         ba_ref[...])                                                       # (2F, TB)
    h = jnp.where(h > 0, h, 0.01 * h)                                       # LeakyReLU
    # Linear(2F->1): VPU multiply + sublane reduce instead of an N=1 matmul.
    logit = jnp.sum(h * wb_ref[...], axis=0, keepdims=True) + bb_ref[0, 0]  # (1, TB)
    o_ref[...] = jax.nn.sigmoid(logit).astype(o_ref.dtype)


def prepare_kernel_params(p):
    """Torch-layout params -> kernel-layout params (split + bf16 matmul weights)."""
    F = p["cw0"].shape[0]
    bf = jnp.bfloat16
    return {
        "cw0": p["cw0"].astype(jnp.float32),
        "cb0": p["cb0"].astype(jnp.float32),
        "cw1": p["cw1"].astype(jnp.float32),
        "cb1": p["cb1"].astype(jnp.float32),
        "w1x": p["w1"][:, :F].astype(bf),   # fc[0].weight (F, 2F) split by input
        "w1c": p["w1"][:, F:].astype(bf),
        "w2": p["w2"].astype(bf),           # fc[2].weight (2F, F) whole
        "wax": p["wa"][:, :F].astype(bf),   # head Linear0 weight (2F, 2F) split by input
        "wac": p["wa"][:, F:].astype(bf),
        "ba": p["ba"].reshape(-1, 1).astype(jnp.float32),
        "wb": p["wb"].reshape(-1, 1).astype(jnp.float32),
        "bb": p["bb"].reshape(1, 1).astype(jnp.float32),
    }


def evaluation_model_forward(x, params, *, tb=2048):
    """x: (B, F) float32.  Returns (B, 1) float32."""
    B, F = x.shape
    kp = prepare_kernel_params(params)

    # Feature-major: batch on the lane axis; pad batch up to a lane-friendly tile.
    tb = min(tb, ((B + 127) // 128) * 128)
    b_pad = ((B + tb - 1) // tb) * tb
    xt = jnp.zeros((F, b_pad), jnp.float32).at[:, :B].set(x.T.astype(jnp.float32))

    grid = (b_pad // tb,)

    def resident(a):
        # Whole-array block with a constant index_map: fetched once, stays in VMEM.
        return pl.BlockSpec(a.shape, lambda i: (0,) * a.ndim)

    in_specs = [
        pl.BlockSpec((F, tb), lambda i: (0, i)),              # x tile (pipelined)
        resident(kp["cw0"]), resident(kp["cb0"]),
        resident(kp["cw1"]), resident(kp["cb1"]),
        resident(kp["w1x"]), resident(kp["w1c"]),
        resident(kp["w2"]),
        resident(kp["wax"]), resident(kp["wac"]),
        resident(kp["ba"]),  resident(kp["wb"]),
        pl.BlockSpec(memory_space=pltpu.MemorySpace.SMEM),    # bb scalar
    ]
    out_specs = pl.BlockSpec((1, tb), lambda i: (0, i))       # lane-dense output

    param_bytes = sum(int(v.size) * v.dtype.itemsize for v in kp.values())
    cost = pl.CostEstimate(
        flops=int(16 * F * F * b_pad),                 # the 5 MXU matmuls (8F^2 MACs/sample)
        transcendentals=int((2 * F + 1) * b_pad),      # sigmoid gates + head sigmoid
        bytes_accessed=int(4 * F * b_pad + 4 * b_pad + param_bytes),
    )

    out = pl.pallas_call(
        _eval_model_kernel,
        out_shape=jax.ShapeDtypeStruct((1, b_pad), jnp.float32),
        grid=grid,
        in_specs=in_specs,
        out_specs=out_specs,
        compiler_params=pltpu.CompilerParams(
            # Batch tiles are independent: megacore-split where available,
            # harmless elsewhere.
            dimension_semantics=("parallel",),
        ),
        cost_estimate=cost,
    )(xt, kp["cw0"], kp["cb0"], kp["cw1"], kp["cb1"],
      kp["w1x"], kp["w1c"], kp["w2"],
      kp["wax"], kp["wac"], kp["ba"], kp["wb"], kp["bb"])

    return out[:, :B].T                                       # (B, 1)


def init_params(key, input_size):
    """Deterministic synthetic parameters in torch layout (weight = (out, in))."""
    F = input_size
    F2 = 2 * F
    ks = jax.random.split(key, 8)

    def xn(k, shape, fan_in, fan_out):
        std = (2.0 / (fan_in + fan_out)) ** 0.5
        return (std * jax.random.normal(k, shape)).astype(jnp.float32)

    return {
        # CrossNet: kernels (F,1) xavier_normal, biases zeros (F,1)
        "cw0": xn(ks[0], (F, 1), F, 1),
        "cb0": jnp.zeros((F, 1), jnp.float32),
        "cw1": xn(ks[1], (F, 1), F, 1),
        "cb1": jnp.zeros((F, 1), jnp.float32),
        # ChannelAttention fc: Linear(2F->F, no bias), Linear(F->2F, no bias)
        "w1": xn(ks[2], (F, F2), F2, F),
        "w2": xn(ks[3], (F2, F), F, F2),
        # head: Linear(2F->2F)+bias, Linear(2F->1)+bias
        "wa": xn(ks[4], (F2, F2), F2, F2),
        "ba": (0.01 * jax.random.normal(ks[5], (F2,))).astype(jnp.float32),
        "wb": xn(ks[6], (1, F2), F2, 1),
        "bb": (0.01 * jax.random.normal(ks[7], (1,))).astype(jnp.float32),
    }


def reference_forward(x, p, matmul_dtype=jnp.float32):
    """Pure-JAX reference mirroring the PyTorch forward.  With
    matmul_dtype=bfloat16 it mimics the kernel's mixed-precision matmuls."""
    dt = matmul_dtype

    def mm(a, w):   # a @ w.T, optionally in bf16 with f32 accumulation
        return jnp.dot(a.astype(dt), w.T.astype(dt),
                       preferred_element_type=jnp.float32)

    x0, xl = x, x
    for cw, cb in ((p["cw0"], p["cb0"]), (p["cw1"], p["cb1"])):
        xl = x0 * (xl @ cw) + cb.T + xl
    stack = jnp.concatenate([x, xl], axis=-1)
    y = mm(jnp.maximum(mm(stack, p["w1"]), 0.0), p["w2"])
    att = stack * jax.nn.sigmoid(y)
    h = mm(att, p["wa"]) + p["ba"]
    h = jnp.where(h > 0, h, 0.01 * h)
    return jax.nn.sigmoid(h @ p["wb"].T + p["bb"])


if __name__ == "__main__":
    input_size = 16   # features per example
    batch = 8

    x = jax.random.normal(jax.random.PRNGKey(0), (batch, input_size),
                          dtype=jnp.float32)
    params = init_params(jax.random.PRNGKey(42), input_size)

    out = evaluation_model_forward(x, params)
    out = jax.block_until_ready(out)
    assert out.shape == (batch, 1)

    # Tight check vs. a reference with the same bf16 matmul precision
    # (validates kernel math: CrossNet, weight splits, activations, biases).
    ref_mix = reference_forward(x, params, matmul_dtype=jnp.bfloat16)
    assert jnp.allclose(out, ref_mix, atol=2e-3), (out, ref_mix)

    # Loose check vs. the full-f32 torch-equivalent reference (bf16 MXU noise).
    ref_f32 = reference_forward(x, params)
    assert jnp.allclose(out, ref_f32, atol=5e-2), (out, ref_f32)

    print("KERNEL_OK")
</pallas_src>

<mosaic_0001>
module attributes {stable_mosaic.version = 11 : i64} {
  func.func @_eval_model_kernel(%arg0: i32, %arg1: memref<16x128xf32, #tpu.memory_space<vmem>>, %arg2: memref<16x1xf32, #tpu.memory_space<vmem>>, %arg3: memref<16x1xf32, #tpu.memory_space<vmem>>, %arg4: memref<16x1xf32, #tpu.memory_space<vmem>>, %arg5: memref<16x1xf32, #tpu.memory_space<vmem>>, %arg6: memref<16x16xbf16, #tpu.memory_space<vmem>>, %arg7: memref<16x16xbf16, #tpu.memory_space<vmem>>, %arg8: memref<32x16xbf16, #tpu.memory_space<vmem>>, %arg9: memref<32x16xbf16, #tpu.memory_space<vmem>>, %arg10: memref<32x16xbf16, #tpu.memory_space<vmem>>, %arg11: memref<32x1xf32, #tpu.memory_space<vmem>>, %arg12: memref<32x1xf32, #tpu.memory_space<vmem>>, %arg13: memref<1x1xf32, #tpu.memory_space<smem>>, %arg14: memref<1x128xf32, #tpu.memory_space<vmem>>) attributes {dimension_semantics = [#tpu.dimension_semantics<parallel>], iteration_bounds = array<i64: 1>, scalar_prefetch = 0 : i64, scratch_operands = 0 : i64, tpu.core_type = #tpu.core_type<tc>, window_params = [{transform_indices = @transform_0, window_bounds = array<i64: 16, 128>}, {pipeline_mode = #tpu.pipeline_mode<synchronous>, transform_indices = @transform_1, window_bounds = array<i64: 16, 1>}, {pipeline_mode = #tpu.pipeline_mode<synchronous>, transform_indices = @transform_2, window_bounds = array<i64: 16, 1>}, {pipeline_mode = #tpu.pipeline_mode<synchronous>, transform_indices = @transform_3, window_bounds = array<i64: 16, 1>}, {pipeline_mode = #tpu.pipeline_mode<synchronous>, transform_indices = @transform_4, window_bounds = array<i64: 16, 1>}, {pipeline_mode = #tpu.pipeline_mode<synchronous>, transform_indices = @transform_5, window_bounds = array<i64: 16, 16>}, {pipeline_mode = #tpu.pipeline_mode<synchronous>, transform_indices = @transform_6, window_bounds = array<i64: 16, 16>}, {pipeline_mode = #tpu.pipeline_mode<synchronous>, transform_indices = @transform_7, window_bounds = array<i64: 32, 16>}, {pipeline_mode = #tpu.pipeline_mode<synchronous>, transform_indices = @transform_8, window_bounds = array<i64: 32, 16>}, {pipeline_mode = #tpu.pipeline_mode<synchronous>, transform_indices = @transform_9, window_bounds = array<i64: 32, 16>}, {pipeline_mode = #tpu.pipeline_mode<synchronous>, transform_indices = @transform_10, window_bounds = array<i64: 32, 1>}, {pipeline_mode = #tpu.pipeline_mode<synchronous>, transform_indices = @transform_11, window_bounds = array<i64: 32, 1>}, {transform_indices = @transform_12, window_bounds = array<i64: 1, 1>}, {transform_indices = @transform_13, window_bounds = array<i64: 1, 128>}]} {
    %c0 = arith.constant 0 : index
    %c0_0 = arith.constant 0 : index
    %0 = vector.load %arg1[%c0, %c0_0] : memref<16x128xf32, #tpu.memory_space<vmem>>, vector<16x128xf32>
    %c0_1 = arith.constant 0 : index
    %c0_2 = arith.constant 0 : index
    %1 = vector.load %arg2[%c0_1, %c0_2] : memref<16x1xf32, #tpu.memory_space<vmem>>, vector<16x1xf32>
    %2 = vector.broadcast %1 : vector<16x1xf32> to vector<16x128xf32>
    %3 = arith.mulf %0, %2 : vector<16x128xf32>
    %cst = arith.constant dense<0.000000e+00> : vector<128xf32>
    %4 = vector.multi_reduction <add>, %3, %cst [0] : vector<16x128xf32> to vector<128xf32>
    %5 = vector.shape_cast %4 : vector<128xf32> to vector<1x128xf32>
    %6 = vector.broadcast %5 : vector<1x128xf32> to vector<16x128xf32>
    %7 = arith.mulf %0, %6 : vector<16x128xf32>
    %c0_3 = arith.constant 0 : index
    %c0_4 = arith.constant 0 : index
    %8 = vector.load %arg3[%c0_3, %c0_4] : memref<16x1xf32, #tpu.memory_space<vmem>>, vector<16x1xf32>
    %9 = vector.broadcast %8 : vector<16x1xf32> to vector<16x128xf32>
    %10 = arith.addf %7, %9 : vector<16x128xf32>
    %11 = arith.addf %10, %0 : vector<16x128xf32>
    %c0_5 = arith.constant 0 : index
    %c0_6 = arith.constant 0 : index
    %12 = vector.load %arg4[%c0_5, %c0_6] : memref<16x1xf32, #tpu.memory_space<vmem>>, vector<16x1xf32>
    %13 = vector.broadcast %12 : vector<16x1xf32> to vector<16x128xf32>
    %14 = arith.mulf %11, %13 : vector<16x128xf32>
    %cst_7 = arith.constant dense<0.000000e+00> : vector<128xf32>
    %15 = vector.multi_reduction <add>, %14, %cst_7 [0] : vector<16x128xf32> to vector<128xf32>
    %16 = vector.shape_cast %15 : vector<128xf32> to vector<1x128xf32>
    %17 = vector.broadcast %16 : vector<1x128xf32> to vector<16x128xf32>
    %18 = arith.mulf %0, %17 : vector<16x128xf32>
    %c0_8 = arith.constant 0 : index
    %c0_9 = arith.constant 0 : index
    %19 = vector.load %arg5[%c0_8, %c0_9] : memref<16x1xf32, #tpu.memory_space<vmem>>, vector<16x1xf32>
    %20 = vector.broadcast %19 : vector<16x1xf32> to vector<16x128xf32>
    %21 = arith.addf %18, %20 : vector<16x128xf32>
    %22 = arith.addf %21, %11 : vector<16x128xf32>
    %23 = arith.truncf %0 : vector<16x128xf32> to vector<16x128xbf16>
    %24 = arith.truncf %22 : vector<16x128xf32> to vector<16x128xbf16>
    %c0_10 = arith.constant 0 : index
    %c0_11 = arith.constant 0 : index
    %25 = vector.load %arg6[%c0_10, %c0_11] : memref<16x16xbf16, #tpu.memory_space<vmem>>, vector<16x16xbf16>
    %cst_12 = arith.constant dense<0.000000e+00> : vector<16x128xf32>
    %26 = tpu.matmul %25, %23, %cst_12 {dimension_numbers = #tpu.dot_dimension_numbers<[1], [0], [0], [1], [0, 0, 1, 1], [], []>} : vector<16x16xbf16>, vector<16x128xbf16>, vector<16x128xf32> -> vector<16x128xf32>
    %c0_13 = arith.constant 0 : index
    %c0_14 = arith.constant 0 : index
    %27 = vector.load %arg7[%c0_13, %c0_14] : memref<16x16xbf16, #tpu.memory_space<vmem>>, vector<16x16xbf16>
    %cst_15 = arith.constant dense<0.000000e+00> : vector<16x128xf32>
    %28 = tpu.matmul %27, %24, %cst_15 {dimension_numbers = #tpu.dot_dimension_numbers<[1], [0], [0], [1], [0, 0, 1, 1], [], []>} : vector<16x16xbf16>, vector<16x128xbf16>, vector<16x128xf32> -> vector<16x128xf32>
    %29 = arith.addf %26, %28 : vector<16x128xf32>
    %cst_16 = arith.constant 0.000000e+00 : f32
    %30 = vector.broadcast %cst_16 : f32 to vector<16x128xf32>
    %31 = arith.maximumf %29, %30 : vector<16x128xf32>
    %32 = arith.truncf %31 : vector<16x128xf32> to vector<16x128xbf16>
    %c0_17 = arith.constant 0 : index
    %c0_18 = arith.constant 0 : index
    %33 = vector.load %arg8[%c0_17, %c0_18] : memref<32x16xbf16, #tpu.memory_space<vmem>>, vector<32x16xbf16>
    %cst_19 = arith.constant dense<0.000000e+00> : vector<32x128xf32>
    %34 = tpu.matmul %33, %32, %cst_19 {dimension_numbers = #tpu.dot_dimension_numbers<[1], [0], [0], [1], [0, 0, 1, 1], [], []>} : vector<32x16xbf16>, vector<16x128xbf16>, vector<32x128xf32> -> vector<32x128xf32>
    %35 = arith.negf %34 : vector<32x128xf32>
    %36 = math.exp %35 : vector<32x128xf32>
    %cst_20 = arith.constant 1.000000e+00 : f32
    %37 = vector.broadcast %cst_20 : f32 to vector<32x128xf32>
    %38 = arith.addf %37, %36 : vector<32x128xf32>
    %39 = arith.divf %37, %38 : vector<32x128xf32>
    %40 = vector.extract_strided_slice %39 {offsets = [0, 0], sizes = [16, 128], strides = [1, 1]} : vector<32x128xf32> to vector<16x128xf32>
    %41 = arith.mulf %0, %40 : vector<16x128xf32>
    %42 = arith.truncf %41 : vector<16x128xf32> to vector<16x128xbf16>
    %43 = vector.extract_strided_slice %39 {offsets = [16, 0], sizes = [16, 128], strides = [1, 1]} : vector<32x128xf32> to vector<16x128xf32>
    %44 = arith.mulf %22, %43 : vector<16x128xf32>
    %45 = arith.truncf %44 : vector<16x128xf32> to vector<16x128xbf16>
    %c0_21 = arith.constant 0 : index
    %c0_22 = arith.constant 0 : index
    %46 = vector.load %arg9[%c0_21, %c0_22] : memref<32x16xbf16, #tpu.memory_space<vmem>>, vector<32x16xbf16>
    %cst_23 = arith.constant dense<0.000000e+00> : vector<32x128xf32>
    %47 = tpu.matmul %46, %42, %cst_23 {dimension_numbers = #tpu.dot_dimension_numbers<[1], [0], [0], [1], [0, 0, 1, 1], [], []>} : vector<32x16xbf16>, vector<16x128xbf16>, vector<32x128xf32> -> vector<32x128xf32>
    %c0_24 = arith.constant 0 : index
    %c0_25 = arith.constant 0 : index
    %48 = vector.load %arg10[%c0_24, %c0_25] : memref<32x16xbf16, #tpu.memory_space<vmem>>, vector<32x16xbf16>
    %cst_26 = arith.constant dense<0.000000e+00> : vector<32x128xf32>
    %49 = tpu.matmul %48, %45, %cst_26 {dimension_numbers = #tpu.dot_dimension_numbers<[1], [0], [0], [1], [0, 0, 1, 1], [], []>} : vector<32x16xbf16>, vector<16x128xbf16>, vector<32x128xf32> -> vector<32x128xf32>
    %50 = arith.addf %47, %49 : vector<32x128xf32>
    %c0_27 = arith.constant 0 : index
    %c0_28 = arith.constant 0 : index
    %51 = vector.load %arg11[%c0_27, %c0_28] : memref<32x1xf32, #tpu.memory_space<vmem>>, vector<32x1xf32>
    %52 = vector.broadcast %51 : vector<32x1xf32> to vector<32x128xf32>
    %53 = arith.addf %50, %52 : vector<32x128xf32>
    %cst_29 = arith.constant 0.000000e+00 : f32
    %54 = vector.broadcast %cst_29 : f32 to vector<32x128xf32>
    %55 = arith.cmpf ogt, %53, %54 : vector<32x128xf32>
    %cst_30 = arith.constant 0.00999999977 : f32
    %56 = vector.broadcast %cst_30 : f32 to vector<32x128xf32>
    %57 = arith.mulf %56, %53 : vector<32x128xf32>
    %58 = arith.select %55, %53, %57 : vector<32x128xi1>, vector<32x128xf32>
    %c0_31 = arith.constant 0 : index
    %c0_32 = arith.constant 0 : index
    %59 = vector.load %arg12[%c0_31, %c0_32] : memref<32x1xf32, #tpu.memory_space<vmem>>, vector<32x1xf32>
    %60 = vector.broadcast %59 : vector<32x1xf32> to vector<32x128xf32>
    %61 = arith.mulf %58, %60 : vector<32x128xf32>
    %cst_33 = arith.constant dense<0.000000e+00> : vector<128xf32>
    %62 = vector.multi_reduction <add>, %61, %cst_33 [0] : vector<32x128xf32> to vector<128xf32>
    %63 = vector.shape_cast %62 : vector<128xf32> to vector<1x128xf32>
    %c0_34 = arith.constant 0 : index
    %c0_35 = arith.constant 0 : index
    %64 = memref.load %arg13[%c0_34, %c0_35] : memref<1x1xf32, #tpu.memory_space<smem>>
    %65 = vector.broadcast %64 : f32 to vector<1x128xf32>
    %66 = arith.addf %63, %65 : vector<1x128xf32>
    %67 = arith.negf %66 : vector<1x128xf32>
    %68 = math.exp %67 : vector<1x128xf32>
    %cst_36 = arith.constant 1.000000e+00 : f32
    %69 = vector.broadcast %cst_36 : f32 to vector<1x128xf32>
    %70 = arith.addf %69, %68 : vector<1x128xf32>
    %71 = arith.divf %69, %70 : vector<1x128xf32>
    %c0_37 = arith.constant 0 : index
    %c0_38 = arith.constant 0 : index
    %72 = vector.load %arg14[%c0_37, %c0_38] : memref<1x128xf32, #tpu.memory_space<vmem>>, vector<1x128xf32>
    tpu.vector_store %arg14[%c0_37, %c0_38], %71 {strides = array<i32>} : memref<1x128xf32, #tpu.memory_space<vmem>>, vector<1x128xf32>,
    return
  }
  func.func @transform_0(%arg0: i32) -> (i32, i32) {
    %c0_i32 = arith.constant 0 : i32
    %c0_i32_0 = arith.constant 0 : i32
    return %c0_i32, %arg0 : i32, i32
  }
  func.func @transform_1(%arg0: i32) -> (i32, i32) {
    %c0_i32 = arith.constant 0 : i32
    %c0_i32_0 = arith.constant 0 : i32
    %c0_i32_1 = arith.constant 0 : i32
    return %c0_i32, %c0_i32_0 : i32, i32
  }
  func.func @transform_2(%arg0: i32) -> (i32, i32) {
    %c0_i32 = arith.constant 0 : i32
    %c0_i32_0 = arith.constant 0 : i32
    %c0_i32_1 = arith.constant 0 : i32
    return %c0_i32, %c0_i32_0 : i32, i32
  }
  func.func @transform_3(%arg0: i32) -> (i32, i32) {
    %c0_i32 = arith.constant 0 : i32
    %c0_i32_0 = arith.constant 0 : i32
    %c0_i32_1 = arith.constant 0 : i32
    return %c0_i32, %c0_i32_0 : i32, i32
  }
  func.func @transform_4(%arg0: i32) -> (i32, i32) {
    %c0_i32 = arith.constant 0 : i32
    %c0_i32_0 = arith.constant 0 : i32
    %c0_i32_1 = arith.constant 0 : i32
    return %c0_i32, %c0_i32_0 : i32, i32
  }
  func.func @transform_5(%arg0: i32) -> (i32, i32) {
    %c0_i32 = arith.constant 0 : i32
    %c0_i32_0 = arith.constant 0 : i32
    %c0_i32_1 = arith.constant 0 : i32
    return %c0_i32, %c0_i32_0 : i32, i32
  }
  func.func @transform_6(%arg0: i32) -> (i32, i32) {
    %c0_i32 = arith.constant 0 : i32
    %c0_i32_0 = arith.constant 0 : i32
    %c0_i32_1 = arith.constant 0 : i32
    return %c0_i32, %c0_i32_0 : i32, i32
  }
  func.func @transform_7(%arg0: i32) -> (i32, i32) {
    %c0_i32 = arith.constant 0 : i32
    %c0_i32_0 = arith.constant 0 : i32
    %c0_i32_1 = arith.constant 0 : i32
    return %c0_i32, %c0_i32_0 : i32, i32
  }
  func.func @transform_8(%arg0: i32) -> (i32, i32) {
    %c0_i32 = arith.constant 0 : i32
    %c0_i32_0 = arith.constant 0 : i32
    %c0_i32_1 = arith.constant 0 : i32
    return %c0_i32, %c0_i32_0 : i32, i32
  }
  func.func @transform_9(%arg0: i32) -> (i32, i32) {
    %c0_i32 = arith.constant 0 : i32
    %c0_i32_0 = arith.constant 0 : i32
    %c0_i32_1 = arith.constant 0 : i32
    return %c0_i32, %c0_i32_0 : i32, i32
  }
  func.func @transform_10(%arg0: i32) -> (i32, i32) {
    %c0_i32 = arith.constant 0 : i32
    %c0_i32_0 = arith.constant 0 : i32
    %c0_i32_1 = arith.constant 0 : i32
    return %c0_i32, %c0_i32_0 : i32, i32
  }
  func.func @transform_11(%arg0: i32) -> (i32, i32) {
    %c0_i32 = arith.constant 0 : i32
    %c0_i32_0 = arith.constant 0 : i32
    %c0_i32_1 = arith.constant 0 : i32
    return %c0_i32, %c0_i32_0 : i32, i32
  }
  func.func @transform_12(%arg0: i32) -> (i32, i32) {
    %c0_i32 = arith.constant 0 : i32
    %c0_i32_0 = arith.constant 0 : i32
    %c0_i32_1 = arith.constant 0 : i32
    return %c0_i32, %c0_i32_0 : i32, i32
  }
  func.func @transform_13(%arg0: i32) -> (i32, i32) {
    %c0_i32 = arith.constant 0 : i32
    %c0_i32_0 = arith.constant 0 : i32
    return %c0_i32, %arg0 : i32, i32
  }
}

</mosaic_0001>

<bundles_post_ra>
// kernel: tpu_custom_call.1
= control target key start
LH: loop header
LB: loop body
LE: loop exit
PB: predicated region body
PF: predicated region fallthrough
CT: control target
= control target key end

     0   :  { %v693_v2 = vmov 0   ;;  %s875_s0 = inlined_call_operand.vmem [shape: f32[16,128], index: 0, kind: input, shape index: {}]   ;;  %s876_s1 = inlined_call_operand.vmem [shape: f32[16,1], index: 1, kind: input, shape index: {}]   ;;  %s877_s2 = inlined_call_operand.vmem [shape: f32[16,1], index: 2, kind: input, shape index: {}]   ;;  %s878_s3 = inlined_call_operand.vmem [shape: f32[16,1], index: 3, kind: input, shape index: {}]   ;;  %s879_s4 = inlined_call_operand.vmem [shape: f32[16,1], index: 4, kind: input, shape index: {}]   ;;  %s880_s5 = inlined_call_operand.vmem [shape: bf16[16,16], index: 5, kind: input, shape index: {}]   ;;  %s881_s6 = inlined_call_operand.vmem [shape: bf16[16,16], index: 6, kind: input, shape index: {}]   ;;  %s882_s7 = inlined_call_operand.vmem [shape: bf16[32,16], index: 7, kind: input, shape index: {}]   ;;  %s883_s8 = inlined_call_operand.vmem [shape: bf16[32,16], index: 8, kind: input, shape index: {}]   ;;  %s884_s9 = inlined_call_operand.vmem [shape: bf16[32,16], index: 9, kind: input, shape index: {}]   ;;  %s885_s10 = inlined_call_operand.vmem [shape: f32[32,1], index: 10, kind: input, shape index: {}]   ;;  %s886_s11 = inlined_call_operand.vmem [shape: f32[32,1], index: 11, kind: input, shape index: {}]   ;;  %s887_s12 = inlined_call_operand.<no memory space> [shape: f32[1,1], index: 12, kind: input, shape index: {}]   ;;  %s888_s13 = inlined_call_operand.hbm [shape: f32[1,128], index: 13, kind: output, shape index: {}]  }
   0x1   :  { %v72_v0 = vld [vmem:[%s877_s2] sm:$0xff]  ;;  %642 = vset.pattern.permute.xlu1 %v693_v2  ;;  %641 = vset.pattern.permute.xlu0 %v693_v2  ;;  %v73_v3 = vld [vmem:[%s877_s2 + $0x8] sm:$0xff] }
   0x2   :  { %v49_v1 = vld [vmem:[%s876_s1] sm:$0xff]  ;;  %76 = vperm.xlu1 %642, %v72_v0   ;;  %v50_v4 = vld [vmem:[%s876_s1 + $0x8] sm:$0xff] }
   0x3   :  { %53 = vperm.xlu0 %641, %v49_v1   ;;  %v89_v5 = vld [vmem:[%s878_s3 + $0x8] sm:$0xff]  ;;  %v88_v6 = vld [vmem:[%s878_s3] sm:$0xff] }
   0x4   :  { %v112_v7 = vld [vmem:[%s879_s4 + $0x8] sm:$0xff]  ;;  %v111_v8 = vld [vmem:[%s879_s4] sm:$0xff] }
   0x6   :  { %81 = vperm.xlu1 %642, %v73_v3  }
   0x7   :  { %58 = vperm.xlu0 %641, %v50_v4  }
   0xa   :  { %97 = vperm.xlu1 %642, %v89_v5  }
   0xb   :  { %92 = vperm.xlu0 %641, %v88_v6  }
   0xc   :  { %19 = vsyncpa [#allocation4], 0  ;;  %v473_v9 = vld [vmem:[%s885_s10 + $0x8] sm:$0xff]  ;;  %v472_v10 = vld [vmem:[%s885_s10] sm:$0xff]  ;;  %v694_v20 = vmov 0.0   ;;  %vm695_vm0 = vmmov 0  }
   0xd   :  { %v475_v11 = vld [vmem:[%s885_s10 + $0x18] sm:$0xff]  ;;  %v474_v12 = vld [vmem:[%s885_s10 + $0x10] sm:$0xff]  ;;  %v513_v13 = vld [vmem:[%s886_s11 + $0x8] sm:$0xff]  ;;  %613 = vmatprep.subr.bf16.mxu1 %v694_v20  ;;  %607 = vmatprep.subr.bf16.mxu0 %v694_v20  ;;  %vm138_vm1 = vcmask 130048   ;;  %s696_s29 = smov [#allocation3]  }
   0xe   :  { %120 = vperm.xlu1 %642, %v112_v7   ;;  %v512_v14 = vld [vmem:[%s886_s11] sm:$0xff]  ;;  %v515_v15 = vld [vmem:[%s886_s11 + $0x18] sm:$0xff]  ;;  %v514_v16 = vld [vmem:[%s886_s11 + $0x10] sm:$0xff]  ;;  %615 = vmatprep.mubr.msk.bf16.mxu1 %vm695_vm0, %v694_v20  ;;  %s565_s30 = sshll.u32 %s696_s29, 4  ;;  %s566_s30 = int_to_ptr.vmem [resolvable:$true] %s565_s30 }
   0xf   :  { %115 = vperm.xlu0 %641, %v111_v8   ;;  %v818_v17 = vld [vmem:[%s875_s0] sm:$0xff]  ;;  %v823_v18 = vld [vmem:[%s875_s0 + $0x8] sm:$0xff]  ;;  %609 = vmatprep.mubr.msk.bf16.mxu0 %vm695_vm0, %v694_v20  ;;  %s671_s14 = scalar_lea.vmem %s566_s30, 16  ;;  %s675_s15 = scalar_lea.vmem %s566_s30, 32 }
  0x10   :  { %v127_v19 = vpack.c.bf16 %v823_v18, %v818_v17  ;;  %v643_v21 = vld [vmem:[%s880_s5] sm:$0xff]   ;;  %p672_p0 = scmp.ne.s32.totalorder %s566_s30, %s671_s14  ;;  %p676_p1 = scmp.lt.s32.totalorder %s566_s30, %s566_s30 }
  0x11   :  { %v644_v61 = vld [vmem:[%s881_s6] sm:$0xff]   ;;  %p677_p2 = scmp.lt.s32.totalorder %s675_s15, %s671_s14 }
  0x12   :  { %483 = vperm.xlu1 %642, %v473_v9   ;;  %614 = vmatpush3.bf16.msra.mxu1 %v127_v19  ;;  %v645_v2 = vld [vmem:[%s882_s7] sm:$0xff]  }
  0x13   :  { %478 = vperm.xlu0 %641, %v472_v10   ;;  %p678_p3 = por %p677_p2, %p676_p1 }
  0x15   :  { %616 = vmatmul.mubr.msk.bf16.vlgmr.msra.gmra.mxu1 %vm138_vm1, %v643_v21  ;;  %p679_p4 = pnand %p678_p3, %p672_p0 }
  0x16   :  { %493 = vperm.xlu1 %642, %v475_v11  }
  0x17   :  { %488 = vperm.xlu0 %641, %v474_v12   ;;  %v646_v12 = vld [vmem:[%s882_s7 + $0x8] sm:$0xff]  }
  0x1a   :  { %523 = vperm.xlu1 %642, %v513_v13   ;;  %v647_v13 = vld [vmem:[%s884_s9] sm:$0xff]  }
  0x1b   :  { %518 = vperm.xlu0 %641, %v512_v14   ;;  %627 = vmatprep.mubr.msk.bf16.mxu1 %vm138_vm1, %v647_v13  ;;  %v649_v14 = vld [vmem:[%s883_s8] sm:$0xff]  }
  0x1e   :  { %533 = vperm.xlu1 %642, %v515_v15  }
  0x1f   :  { %528 = vperm.xlu0 %641, %v514_v16  }
  0x7d   :  { %v77_v30 = vpop.permute.xlu1 %76 }
  0x7e   :  { %v54_v22 = vpop.permute.xlu0 %53 }
  0x7f   :  { %v61_v24 = vmul.f32 %v54_v22, %v818_v17 }
  0x81   :  { %v82_v34 = vpop.permute.xlu1 %81 }
  0x82   :  { %v59_v23 = vpop.permute.xlu0 %58 }
  0x83   :  { %v62_v25 = vmul.f32 %v59_v23, %v823_v18 }
  0x85   :  { %v63_v26 = vadd.f32 %v62_v25, %v61_v24  ;;  %v98_v41 = vpop.permute.xlu1 %97 }
  0x86   :  { %v93_v42 = vpop.permute.xlu0 %92 }
  0x87   :  { %v64_v27 = vrot.slane %v63_v26, 4 }
  0x89   :  { %v65_v28 = vadd.f32 %v64_v27, %v63_v26  ;;  %v121_v54 = vpop.permute.xlu1 %120 }
  0x8a   :  { %v116_v55 = vpop.permute.xlu0 %115 }
  0x8b   :  { %v66_v29 = vrot.slane %v65_v28, 2 }
  0x8d   :  { %v67_v31 = vadd.f32 %v66_v29, %v65_v28 }
  0x8f   :  { %v68_v32 = vrot.slane %v67_v31, 1 }
  0x91   :  { %v69_v33 = vadd.f32 %v68_v32, %v67_v31 }
  0x93   :  { %v71_v35 = vmul.f32 %v69_v33, %v823_v18  ;;  %v70_v36 = vmul.f32 %v69_v33, %v818_v17 }
  0x95   :  { %v85_v37 = vadd.f32 %v82_v34, %v71_v35  ;;  %v84_v38 = vadd.f32 %v77_v30, %v70_v36 }
  0x97   :  { %v87_v39 = vadd.f32 %v85_v37, %v823_v18  ;;  %v86_v40 = vadd.f32 %v84_v38, %v818_v17 }
  0x99   :  { %v101_v43 = vmul.f32 %v98_v41, %v87_v39  ;;  %v100_v44 = vmul.f32 %v93_v42, %v86_v40 }
  0x9b   :  { %v102_v45 = vadd.f32 %v101_v43, %v100_v44  ;;  %v648_v43 = vld [vmem:[%s884_s9 + $0x8] sm:$0xff]  }
  0x9c   :  { %v650_v44 = vld [vmem:[%s883_s8 + $0x8] sm:$0xff]  }
  0x9d   :  { %v103_v46 = vrot.slane %v102_v45, 4 }
  0x9f   :  { %v104_v47 = vadd.f32 %v103_v46, %v102_v45 }
  0xa1   :  { %v105_v48 = vrot.slane %v104_v47, 2 }
  0xa3   :  { %v106_v49 = vadd.f32 %v105_v48, %v104_v47 }
  0xa5   :  { %v107_v50 = vrot.slane %v106_v49, 1 }
  0xa7   :  { %v108_v51 = vadd.f32 %v107_v50, %v106_v49 }
  0xa9   :  { %v110_v52 = vmul.f32 %v108_v51, %v823_v18  ;;  %v109_v53 = vmul.f32 %v108_v51, %v818_v17 }
  0xab   :  { %v124_v56 = vadd.f32 %v121_v54, %v110_v52  ;;  %v123_v57 = vadd.f32 %v116_v55, %v109_v53 }
  0xad   :  { %v126_v58 = vadd.f32 %v124_v56, %v87_v39  ;;  %v125_v59 = vadd.f32 %v123_v57, %v86_v40 }
  0xaf   :  { %v128_v60 = vpack.c.bf16 %v126_v58, %v125_v59 }
  0xb1   :  { %608 = vmatpush3.bf16.msra.mxu0 %v128_v60 }
  0xb4   :  { %610 = vmatmul.mubr.msk.bf16.vlgmr.msra.gmra.mxu0 %vm138_vm1, %v644_v61 }
  0xb5   :  { %621 = vmatprep.mubr.msk.bf16.mxu0 %vm138_vm1, %v645_v2 }
  0xd5   :  { %v225_v62 = vpop.f32.mrf.mxu1 }
  0xd7   :  { %v617_v63 = vpop.f32.mrf.mxu1 }
  0xd9   :  { %v228_v0 = vpop.f32.mrf.mxu1 }
  0xdb   :  { %v618_v1 = vpop.f32.mrf.mxu1 }
 0x174   :  { %v176_v3 = vpop.f32.mrf.mxu0 }
 0x175   :  { %v226_v5 = vadd.f32 %v225_v62, %v176_v3 }
 0x176   :  { %v611_v4 = vpop.f32.mrf.mxu0 }
 0x177   :  { %v232_v9 = vmax.f32 %v226_v5, 0.0 }
 0x178   :  { %v179_v6 = vpop.f32.mrf.mxu0 }
 0x179   :  { %v229_v7 = vadd.f32 %v228_v0, %v179_v6 }
 0x17a   :  { %v612_v8 = vpop.f32.mrf.mxu0 }
 0x17b   :  { %v233_v10 = vmax.f32 %v229_v7, 0.0 }
 0x17d   :  { %v234_v11 = vpack.c.bf16 %v233_v10, %v232_v9 }
 0x17f   :  { %619 = vmatprep.subr.bf16.mxu0 %v234_v11 }
 0x180   :  { %620 = vmatpush3.bf16.msra.mxu0 %v234_v11 }
 0x183   :  { %622 = vmatmul.mubr.msk.bf16.vlgmr.msra.gmra.mxu0 %vm138_vm1, %v646_v12 }
 0x184   :  { %633 = vmatprep.mubr.msk.bf16.mxu0 %vm138_vm1, %v649_v14 }
 0x243   :  { %v623_v15 = vpop.f32.mrf.mxu0 }
 0x244   :  { %v583_v16 = vmul.f32 -1.442695, %v623_v15 }
 0x245   :  { %v289_v19 = vpop.f32.mrf.mxu0 }
 0x246   :  { %651 = vpow2.f32 %v583_v16  ;;  %v581_v20 = vmul.f32 -1.442695, %v289_v19 }
 0x247   :  { %v624_v21 = vpop.f32.mrf.mxu0 }
 0x248   :  { %653 = vpow2.f32 %v581_v20  ;;  %v584_v22 = vmul.f32 -1.442695, %v624_v21 }
 0x249   :  { %v292_v23 = vpop.f32.mrf.mxu0 }
 0x24a   :  { %655 = vpow2.f32 %v584_v22  ;;  %v582_v24 = vmul.f32 -1.442695, %v292_v23 }
 0x24c   :  { %657 = vpow2.f32 %v582_v24 }
 0x253   :  { %v652_v25 = vpop.eup %651 }
 0x254   :  { %v318_v26 = vadd.f32 1.0, %v652_v25  ;;  %v550_v25 = vstv %s887_s12 }
 0x255   :  { %v654_v27 = vpop.eup %653 }
 0x256   :  { %v316_v28 = vadd.f32 1.0, %v654_v27  ;;  %659 = vrcp.f32 %v318_v26 }
 0x257   :  { %v656_v29 = vpop.eup %655 }
 0x258   :  { %v319_v30 = vadd.f32 1.0, %v656_v29  ;;  %661 = vrcp.f32 %v316_v28 }
 0x259   :  { %v658_v31 = vpop.eup %657 }
 0x25a   :  { %663 = vrcp.f32 %v319_v30  ;;  %v317_v32 = vadd.f32 1.0, %v658_v31 }
 0x25c   :  { %665 = vrcp.f32 %v317_v32 }
 0x263   :  { %v660_v33 = vpop.eup %659 }
 0x264   :  { %v331_v36 = vmul.f32 %v660_v33, %v125_v59 }
 0x265   :  { %v662_v34 = vpop.eup %661 }
 0x266   :  { %v328_v40 = vmul.f32 %v662_v34, %v818_v17  ;;  %v479_v17 = vpop.permute.xlu0 %478 }
 0x267   :  { %v664_v35 = vpop.eup %663 }
 0x268   :  { %v332_v37 = vmul.f32 %v664_v35, %v126_v58 }
 0x269   :  { %v666_v38 = vpop.eup %665 }
 0x26a   :  { %v333_v39 = vpack.c.bf16 %v332_v37, %v331_v36  ;;  %v329_v41 = vmul.f32 %v666_v38, %v823_v18  ;;  %v484_v18 = vpop.permute.xlu1 %483  ;;  %v489_v52 = vpop.permute.xlu0 %488 }
 0x26c   :  { %625 = vmatprep.subr.bf16.mxu1 %v333_v39  ;;  %v330_v42 = vpack.c.bf16 %v329_v41, %v328_v40 }
 0x26d   :  { %626 = vmatpush3.bf16.msra.mxu1 %v333_v39 }
 0x26e   :  { %631 = vmatprep.subr.bf16.mxu0 %v330_v42  ;;  %v494_v56 = vpop.permute.xlu1 %493  ;;  %v519_v63 = vpop.permute.xlu0 %518 }
 0x26f   :  { %632 = vmatpush3.bf16.msra.mxu0 %v330_v42 }
 0x270   :  { %628 = vmatmul.mubr.msk.bf16.vlgmr.msra.gmra.mxu1 %vm138_vm1, %v648_v43 }
 0x272   :  { %634 = vmatmul.mubr.msk.bf16.vlgmr.msra.gmra.mxu0 %vm138_vm1, %v650_v44  ;;  %v524_v2 = vpop.permute.xlu1 %523  ;;  %v529_v10 = vpop.permute.xlu0 %528 }
 0x276   :  { %v534_v14 = vpop.permute.xlu1 %533 }
 0x330   :  { %v629_v45 = vpop.f32.mrf.mxu1 }
 0x332   :  { %v635_v46 = vpop.f32.mrf.mxu0  ;;  %v392_v47 = vpop.f32.mrf.mxu1 }
 0x333   :  { %v466_v48 = vadd.f32 %v635_v46, %v629_v45 }
 0x334   :  { %v457_v49 = vpop.f32.mrf.mxu0  ;;  %v630_v51 = vpop.f32.mrf.mxu1 }
 0x335   :  { %v458_v50 = vadd.f32 %v457_v49, %v392_v47  ;;  %v498_v57 = vadd.f32 %v489_v52, %v466_v48 }
 0x336   :  { %v636_v53 = vpop.f32.mrf.mxu0  ;;  %v395_v59 = vpop.f32.mrf.mxu1 }
 0x337   :  { %v496_v54 = vadd.f32 %v479_v17, %v458_v50  ;;  %v469_v55 = vadd.f32 %v636_v53, %v630_v51  ;;  %v506_v0 = vmul.f32 0.01, %v498_v57  ;;  %vm502_vm3 = vcmp.gt.f32.partialorder %v498_v57, 0.0 }
 0x338   :  { %v460_v58 = vpop.f32.mrf.mxu0 }
 0x339   :  { %v504_v60 = vmul.f32 0.01, %v496_v54  ;;  %v499_v61 = vadd.f32 %v494_v56, %v469_v55  ;;  %v461_v62 = vadd.f32 %v460_v58, %v395_v59  ;;  %vm500_vm2 = vcmp.gt.f32.partialorder %v496_v54, 0.0 }
 0x33a   :  { %v510_v6 = vsel %vm502_vm3, %v498_v57, %v506_v0 }
 0x33b   :  { %v497_v1 = vadd.f32 %v484_v18, %v461_v62  ;;  %v508_v3 = vsel %vm500_vm2, %v496_v54, %v504_v60  ;;  %v507_v4 = vmul.f32 0.01, %v499_v61  ;;  %vm503_vm5 = vcmp.gt.f32.partialorder %v499_v61, 0.0 }
 0x33c   :  { %v536_v8 = vmul.f32 %v519_v63, %v508_v3  ;;  %v538_v12 = vmul.f32 %v529_v10, %v510_v6 }
 0x33d   :  { %vm501_vm4 = vcmp.gt.f32.partialorder %v497_v1, 0.0  ;;  %v505_v5 = vmul.f32 0.01, %v497_v1  ;;  %v511_v11 = vsel %vm503_vm5, %v499_v61, %v507_v4 }
 0x33e   :  { %v539_v15 = vmul.f32 %v534_v14, %v511_v11 }
 0x33f   :  { %v509_v7 = vsel %vm501_vm4, %v497_v1, %v505_v5 }
 0x340   :  { %v537_v9 = vmul.f32 %v524_v2, %v509_v7 }
 0x342   :  { %v540_v13 = vadd.f32 %v537_v9, %v536_v8 }
 0x344   :  { %v541_v16 = vadd.f32 %v540_v13, %v538_v12 }
 0x346   :  { %v542_v19 = vadd.f32 %v541_v16, %v539_v15 }
 0x348   :  { %v543_v20 = vrot.slane %v542_v19, 4 }
 0x34a   :  { %v544_v21 = vadd.f32 %v543_v20, %v542_v19 }
 0x34c   :  { %v545_v22 = vrot.slane %v544_v21, 2 }
 0x34e   :  { %v546_v23 = vadd.f32 %v545_v22, %v544_v21 }
 0x350   :  { %v547_v24 = vrot.slane %v546_v23, 1 }
 0x352   :  { %v548_v26 = vadd.f32 %v547_v24, %v546_v23 }
 0x354   :  { %v551_v27 = vadd.f32 %v550_v25, %v548_v26 }
 0x356   :  { %v593_v28 = vmul.f32 -1.442695, %v551_v27 }
 0x358   :  { %667 = vpow2.f32 %v593_v28 }
 0x365   :  { %v668_v29 = vpop.eup %667 }
 0x366   :  { %v555_v30 = vadd.f32 1.0, %v668_v29 }
 0x368   :  { %669 = vrcp.f32 %v555_v30 }
 0x375   :  { %v670_v31 = vpop.eup %669 }
 0x376   :  { %558 = vst [vmem:[#allocation3] sm:$0x1] %v670_v31 }
 0x377   :  { %682 = shalt.err (!%p679_p4)
}
 0x378   :  { %568 = dma.vmem_to_hbm [thread:$0]  %s566_s30, 16, %s888_s13, [#allocation4]  }
 0x379   :  { %691 = dma.done.wait [#allocation4], 16  }
 0x37a   :  { %692 = vsyncadd [#allocation4], 4294967280 }
 0x37b   :  { %572 = vsyncpa [#allocation4], 1 }

</bundles_post_ra>
